<compile_context>
chip_gen: v6e
topology: v6e:2x2x1
jax: 0.10.0
libtpu: 0.0.40
codegen_flags: <defaults>
</compile_context>

<pallas_src>
import jax
import jax.numpy as jnp
from jax.experimental import pallas as pl
from jax.experimental.pallas import tpu as pltpu


def _round_up(x, m):
    return ((x + m - 1) // m) * m


def nnlm_kernel(x_ref, w1_ref, b1_ref, w2_ref, b2_ref, out_ref):
    # x : [TB, Dp]   bf16
    # w1: [Dp, Hp]   bf16      b1: [1, Hp] f32
    # w2: [Dp+Hp,Cp] bf16      b2: [1, Cp] f32   (w2 = [[W22],[W21]] fused)
    # out:[TB, Cp]   f32
    x = x_ref[...]

    # Hidden layer: bf16 MXU matmul with f32 accumulation, f32 bias + tanh (EUP).
    h = jnp.tanh(
        jnp.dot(x, w1_ref[...], preferred_element_type=jnp.float32) + b1_ref[...]
    )                                                            # [TB, Hp] f32

    # Fused output projection: single MXU pass over K = Dp + Hp.
    xh = jnp.concatenate([x, h.astype(jnp.bfloat16)], axis=-1)   # [TB, Dp+Hp] bf16
    out = (
        jnp.dot(xh, w2_ref[...], preferred_element_type=jnp.float32)
        + b2_ref[...]
    )                                                            # [TB, Cp] f32
    out_ref[...] = out.astype(out_ref.dtype)


def nnlm_forward(inputs, emb_table, w1, b1, w21, w22, b2, *, tb_max=256):
    """inputs: [B, n_steps] int32 token ids.

    Weights are stored [in, out] (transposed vs. PyTorch nn.Linear):
      w1:[D,H]  b1:[H]  w21:[H,C]  w22:[D,C]  b2:[C],  D = n_steps*embed_dim.
    """
    B = inputs.shape[0]
    D, H = w1.shape
    C = w21.shape[1]

    # Glue: embedding gather + flatten (not the hot path at these shapes).
    # TODO(synk): fuse the gather into the kernel via PrefetchScalarGridSpec
    # (token ids in SMEM + pl.Element row fetch) once vocab/embed_dim grow.
    x = jnp.take(emb_table, inputs, axis=0).reshape(B, -1)       # [B, D] f32

    # Lane-dense padding (multiples of 128 on every matmul / output last dim).
    Dp = _round_up(D, 128)
    Hp = _round_up(H, 128)
    Cp = _round_up(C, 128)

    # Batch tiling: TB is a multiple of 8 sublanes, up to tb_max rows/block.
    TB = min(tb_max, _round_up(B, 8))
    Bp = _round_up(B, TB)
    grid_b = Bp // TB

    # Zero-padded, bf16 operands (zero padding keeps the valid slice exact:
    # padded H columns give tanh(0)=0 and hit zero rows of W2).
    x_p = jnp.zeros((Bp, Dp), jnp.bfloat16).at[:B, :D].set(x.astype(jnp.bfloat16))
    w1_p = jnp.zeros((Dp, Hp), jnp.bfloat16).at[:D, :H].set(w1.astype(jnp.bfloat16))
    b1_p = jnp.zeros((1, Hp), jnp.float32).at[0, :H].set(b1)
    w2_p = jnp.zeros((Dp + Hp, Cp), jnp.bfloat16)
    w2_p = w2_p.at[:D, :C].set(w22.astype(jnp.bfloat16))          # x rows
    w2_p = w2_p.at[Dp:Dp + H, :C].set(w21.astype(jnp.bfloat16))   # h rows
    b2_p = jnp.zeros((1, Cp), jnp.float32).at[0, :C].set(b2)

    cost = pl.CostEstimate(
        flops=2 * Bp * (Dp * Hp + (Dp + Hp) * Cp),
        transcendentals=Bp * Hp,
        bytes_accessed=(x_p.size * 2 + w1_p.size * 2 + w2_p.size * 2
                        + b1_p.size * 4 + b2_p.size * 4 + Bp * Cp * 4),
    )

    out_p = pl.pallas_call(
        nnlm_kernel,
        out_shape=jax.ShapeDtypeStruct((Bp, Cp), jnp.float32),
        grid_spec=pltpu.PrefetchScalarGridSpec(
            num_scalar_prefetch=0,
            grid=(grid_b,),
            in_specs=[
                pl.BlockSpec((TB, Dp), lambda i: (i, 0)),        # x: batch-tiled
                pl.BlockSpec((Dp, Hp), lambda i: (0, 0)),        # W1: resident
                pl.BlockSpec((1, Hp), lambda i: (0, 0)),         # b1: resident
                pl.BlockSpec((Dp + Hp, Cp), lambda i: (0, 0)),   # W2: resident
                pl.BlockSpec((1, Cp), lambda i: (0, 0)),         # b2: resident
            ],
            out_specs=pl.BlockSpec((TB, Cp), lambda i: (i, 0)),
        ),
        compiler_params=pltpu.CompilerParams(
            dimension_semantics=("parallel",),
        ),
        cost_estimate=cost,
    )(x_p, w1_p, b1_p, w2_p, b2_p)

    return out_p[:B, :C]


def reference_forward(inputs, emb_table, w1, b1, w21, w22, b2):
    x = jnp.take(emb_table, inputs, axis=0).reshape(inputs.shape[0], -1)
    h = jnp.tanh(x @ w1 + b1)
    return h @ w21 + x @ w22 + b2


if __name__ == "__main__":
    # Model hyperparameters (small, consistent with the module's forward).
    n_steps, n_classes, embed_dim, h_dim = 8, 32, 16, 32
    batch = 8
    D = n_steps * embed_dim  # 128

    key = jax.random.PRNGKey(0)
    k_emb, k_w1, k_w21, k_w22, k_in = jax.random.split(key, 5)

    # Deterministic parameter init (shapes mirror nn.Embedding / nn.Linear).
    emb_table = jax.random.normal(k_emb, (n_classes, embed_dim), jnp.float32)
    # PyTorch Linear stores weight as [out, in]; we store [in, out] for the kernel.
    w1 = jax.random.normal(k_w1, (D, h_dim), jnp.float32) * 0.05
    w21 = jax.random.normal(k_w21, (h_dim, n_classes), jnp.float32) * 0.05
    w22 = jax.random.normal(k_w22, (D, n_classes), jnp.float32) * 0.05
    b1 = jnp.ones((h_dim,), jnp.float32)      # nn.Parameter(torch.ones(h_dim))
    b2 = jnp.ones((n_classes,), jnp.float32)  # nn.Parameter(torch.ones(n_classes))

    inputs = jax.random.randint(k_in, (batch, n_steps), 0, n_classes, jnp.int32)

    out = nnlm_forward(inputs, emb_table, w1, b1, w21, w22, b2)
    out = jax.block_until_ready(out)

    ref = reference_forward(inputs, emb_table, w1, b1, w21, w22, b2)
    assert out.shape == (batch, n_classes)
    # bf16 matmul operands with f32 accumulation -> loosened tolerance vs f32 ref.
    assert jnp.allclose(out, ref, atol=2e-2, rtol=2e-2), "mismatch vs JAX reference"

    print("KERNEL_OK")
</pallas_src>

<mosaic_0001>
module attributes {stable_mosaic.version = 11 : i64} {
  func.func @nnlm_kernel(%arg0: i32, %arg1: memref<8x128xbf16, #tpu.memory_space<vmem>>, %arg2: memref<128x128xbf16, #tpu.memory_space<vmem>>, %arg3: memref<1x128xf32, #tpu.memory_space<vmem>>, %arg4: memref<256x128xbf16, #tpu.memory_space<vmem>>, %arg5: memref<1x128xf32, #tpu.memory_space<vmem>>, %arg6: memref<8x128xf32, #tpu.memory_space<vmem>>) attributes {dimension_semantics = [#tpu.dimension_semantics<parallel>], iteration_bounds = array<i64: 1>, scalar_prefetch = 0 : i64, scratch_operands = 0 : i64, tpu.core_type = #tpu.core_type<tc>, window_params = [{transform_indices = @transform_0, window_bounds = array<i64: 8, 128>}, {pipeline_mode = #tpu.pipeline_mode<synchronous>, transform_indices = @transform_1, window_bounds = array<i64: 128, 128>}, {pipeline_mode = #tpu.pipeline_mode<synchronous>, transform_indices = @transform_2, window_bounds = array<i64: 1, 128>}, {pipeline_mode = #tpu.pipeline_mode<synchronous>, transform_indices = @transform_3, window_bounds = array<i64: 256, 128>}, {pipeline_mode = #tpu.pipeline_mode<synchronous>, transform_indices = @transform_4, window_bounds = array<i64: 1, 128>}, {transform_indices = @transform_5, window_bounds = array<i64: 8, 128>}]} {
    %c0 = arith.constant 0 : index
    %c0_0 = arith.constant 0 : index
    %0 = vector.load %arg1[%c0, %c0_0] : memref<8x128xbf16, #tpu.memory_space<vmem>>, vector<8x128xbf16>
    %c0_1 = arith.constant 0 : index
    %c0_2 = arith.constant 0 : index
    %1 = vector.load %arg2[%c0_1, %c0_2] : memref<128x128xbf16, #tpu.memory_space<vmem>>, vector<128x128xbf16>
    %cst = arith.constant dense<0.000000e+00> : vector<8x128xf32>
    %2 = tpu.matmul %0, %1, %cst {dimension_numbers = #tpu.dot_dimension_numbers<[1], [0], [0], [1], [0, 0, 1, 1], [], []>} : vector<8x128xbf16>, vector<128x128xbf16>, vector<8x128xf32> -> vector<8x128xf32>
    %c0_3 = arith.constant 0 : index
    %c0_4 = arith.constant 0 : index
    %3 = vector.load %arg3[%c0_3, %c0_4] : memref<1x128xf32, #tpu.memory_space<vmem>>, vector<1x128xf32>
    %4 = vector.broadcast %3 : vector<1x128xf32> to vector<8x128xf32>
    %5 = arith.addf %2, %4 : vector<8x128xf32>
    %6 = math.tanh %5 : vector<8x128xf32>
    %7 = arith.truncf %6 : vector<8x128xf32> to vector<8x128xbf16>
    %8 = tpu.concatenate %0, %7 in 1 : vector<8x128xbf16>, vector<8x128xbf16> -> vector<8x256xbf16>
    %c0_5 = arith.constant 0 : index
    %c0_6 = arith.constant 0 : index
    %9 = vector.load %arg4[%c0_5, %c0_6] : memref<256x128xbf16, #tpu.memory_space<vmem>>, vector<256x128xbf16>
    %cst_7 = arith.constant dense<0.000000e+00> : vector<8x128xf32>
    %10 = tpu.matmul %8, %9, %cst_7 {dimension_numbers = #tpu.dot_dimension_numbers<[1], [0], [0], [1], [0, 0, 1, 1], [], []>} : vector<8x256xbf16>, vector<256x128xbf16>, vector<8x128xf32> -> vector<8x128xf32>
    %c0_8 = arith.constant 0 : index
    %c0_9 = arith.constant 0 : index
    %11 = vector.load %arg5[%c0_8, %c0_9] : memref<1x128xf32, #tpu.memory_space<vmem>>, vector<1x128xf32>
    %12 = vector.broadcast %11 : vector<1x128xf32> to vector<8x128xf32>
    %13 = arith.addf %10, %12 : vector<8x128xf32>
    %c0_10 = arith.constant 0 : index
    %c0_11 = arith.constant 0 : index
    %14 = vector.load %arg6[%c0_10, %c0_11] : memref<8x128xf32, #tpu.memory_space<vmem>>, vector<8x128xf32>
    tpu.vector_store %arg6[%c0_10, %c0_11], %13 {strides = array<i32>} : memref<8x128xf32, #tpu.memory_space<vmem>>, vector<8x128xf32>,
    return
  }
  func.func @transform_0(%arg0: i32) -> (i32, i32) {
    %c0_i32 = arith.constant 0 : i32
    %c0_i32_0 = arith.constant 0 : i32
    return %arg0, %c0_i32 : i32, i32
  }
  func.func @transform_1(%arg0: i32) -> (i32, i32) {
    %c0_i32 = arith.constant 0 : i32
    %c0_i32_0 = arith.constant 0 : i32
    %c0_i32_1 = arith.constant 0 : i32
    return %c0_i32, %c0_i32_0 : i32, i32
  }
  func.func @transform_2(%arg0: i32) -> (i32, i32) {
    %c0_i32 = arith.constant 0 : i32
    %c0_i32_0 = arith.constant 0 : i32
    %c0_i32_1 = arith.constant 0 : i32
    return %c0_i32, %c0_i32_0 : i32, i32
  }
  func.func @transform_3(%arg0: i32) -> (i32, i32) {
    %c0_i32 = arith.constant 0 : i32
    %c0_i32_0 = arith.constant 0 : i32
    %c0_i32_1 = arith.constant 0 : i32
    return %c0_i32, %c0_i32_0 : i32, i32
  }
  func.func @transform_4(%arg0: i32) -> (i32, i32) {
    %c0_i32 = arith.constant 0 : i32
    %c0_i32_0 = arith.constant 0 : i32
    %c0_i32_1 = arith.constant 0 : i32
    return %c0_i32, %c0_i32_0 : i32, i32
  }
  func.func @transform_5(%arg0: i32) -> (i32, i32) {
    %c0_i32 = arith.constant 0 : i32
    %c0_i32_0 = arith.constant 0 : i32
    return %arg0, %c0_i32 : i32, i32
  }
}

</mosaic_0001>

<bundles_post_ra>
// kernel: tpu_custom_call.1
= control target key start
LH: loop header
LB: loop body
LE: loop exit
PB: predicated region body
PF: predicated region fallthrough
CT: control target
= control target key end

     0   :  { %10 = vsyncpa [#allocation3], 0  ;;  %s620_s0 = inlined_call_operand.hbm [shape: bf16[8,128], index: 0, kind: input, shape index: {}]   ;;  %s621_s1 = inlined_call_operand.hbm [shape: bf16[128,128], index: 1, kind: input, shape index: {}]   ;;  %s622_s2 = inlined_call_operand.vmem [shape: f32[1,128], index: 2, kind: input, shape index: {}]   ;;  %s623_s3 = inlined_call_operand.hbm [shape: bf16[256,128], index: 3, kind: input, shape index: {}]   ;;  %s624_s4 = inlined_call_operand.vmem [shape: f32[1,128], index: 4, kind: input, shape index: {}]   ;;  %s625_s5 = inlined_call_operand.hbm [shape: f32[8,128], index: 5, kind: output, shape index: {}]  }
   0x1   :  { %11 = vsyncpa [#allocation6], 0 }
   0x2   :  { %12 = vsyncpa [#allocation4], 0  ;;  %s564_s18 = smov [#allocation5]  }
   0x3   :  { %s28_s19 = sshll.u32 %s564_s18, 4  ;;  %s29_s19 = int_to_ptr.vmem [resolvable:$true] %s28_s19 }
   0x4   :  { %s486_s20 = scalar_lea.vmem %s29_s19, 1024  ;;  %p491_p1 = scmp.lt.s32.totalorder %s29_s19, %s29_s19 }
   0x5   :  { %p487_p0 = scmp.ne.s32.totalorder %s29_s19, %s486_s20  ;;  %p492_p2 = scmp.lt.s32.totalorder %s486_s20, %s486_s20 }
   0x7   :  { %p493_p3 = por %p492_p2, %p491_p1 }
   0x9   :  { %p494_p4 = pnand %p493_p3, %p487_p0 }
   0xb   :  { %497 = shalt.err (!%p494_p4)
}
   0xc   :  { %s565_s21 = smov 64   ;;  %s566_s22 = smov 4  }
   0xd   :  { %34 = dma.hbm_to_vmem [thread:$0]  %s621_s1, 1024, %s29_s19, [#allocation6], %s565_s21, %s565_s21, %s566_s22  }
   0xe   :  { %s567_s25 = smov [#allocation2]   ;;  %s568_s27 = smov [#allocation7]  }
   0xf   :  { %s19_s26 = sshll.u32 %s567_s25, 4  ;;  %s42_s28 = sshll.u32 %s568_s27, 4  ;;  %s20_s26 = int_to_ptr.vmem [resolvable:$true] %s19_s26  ;;  %s43_s28 = int_to_ptr.vmem [resolvable:$true] %s42_s28 }
  0x10   :  { %s506_s29 = scalar_lea.vmem %s20_s26, 64  ;;  %p511_p6 = scmp.lt.s32.totalorder %s20_s26, %s20_s26 }
  0x11   :  { %p507_p5 = scmp.ne.s32.totalorder %s20_s26, %s506_s29  ;;  %p512_p7 = scmp.lt.s32.totalorder %s506_s29, %s506_s29 }
  0x13   :  { %p513_p8 = por %p512_p7, %p511_p6 }
  0x15   :  { %p514_p9 = pnand %p513_p8, %p507_p5 }
  0x17   :  { %517 = shalt.err (!%p514_p9)
}
  0x18   :  { %22 = dma.hbm_to_vmem [thread:$0]  %s620_s0, 64, %s20_s26, [#allocation3]  }
  0x19   :  { %s526_s7 = scalar_lea.vmem %s43_s28, 2048  ;;  %p531_p11 = scmp.lt.s32.totalorder %s43_s28, %s43_s28 }
  0x1a   :  { %p527_p10 = scmp.ne.s32.totalorder %s43_s28, %s526_s7  ;;  %p532_p12 = scmp.lt.s32.totalorder %s526_s7, %s526_s7 }
  0x1c   :  { %p533_p13 = por %p532_p12, %p531_p11 }
  0x1e   :  { %p534_p0 = pnand %p533_p13, %p527_p10 }
  0x20   :  { %537 = shalt.err (!%p534_p0)
}
  0x21   :  { %48 = dma.hbm_to_vmem [thread:$0]  %s623_s3, 2048, %s43_s28, [#allocation6], %s565_s21, %s565_s21, %s566_s22  }
  0x22   :  { %558 = dma.done.wait [#allocation3], 64  }
  0x23   :  { %559 = vsyncadd [#allocation3], 4294967232 }
  0x24   :  { %560 = dma.done.wait [#allocation6], 3072  }
  0x25   :  { %561 = vsyncadd [#allocation6], 4294964224  ;;  %v569_v0 = vmov 0.0   ;;  %vm570_vm0 = vmmov 0   ;;  %v452_v1 = vld [vmem:[#allocation5 + $0x38] sm:$0xff]   ;;  %v453_v2 = vld [vmem:[#allocation5 + $0x30] sm:$0xff]  }
  0x26   :  { %424 = vmatprep.subr.bf16.mxu0 %v569_v0  ;;  %440 = vmatprep.mubr.msk.bf16.mxu0 %vm570_vm0, %v569_v0  ;;  %v454_v3 = vld [vmem:[#allocation5 + $0x28] sm:$0xff]   ;;  %v455_v4 = vld [vmem:[#allocation5 + $0x20] sm:$0xff]   ;;  %v460_v5 = vld [vmem:[#allocation7 + $0x78] sm:$0xff]   ;;  %s571_s11 = smov [#allocation8]  }
  0x27   :  { %425 = vmatpush3.bf16.msra.mxu0 %v452_v1  ;;  %v461_v6 = vld [vmem:[#allocation7 + $0x38] sm:$0xff]   ;;  %402 = vmatprep.subr.bf16.mxu1 %v460_v5  ;;  %v462_v7 = vld [vmem:[#allocation7 + $0x70] sm:$0xff]   ;;  %v464_v9 = vld [vmem:[#allocation7 + $0x68] sm:$0xff]   ;;  %s357_s12 = sshll.u32 %s571_s11, 4  ;;  %s358_s12 = int_to_ptr.vmem [resolvable:$true] %s357_s12 }
  0x28   :  { %426 = vmatprep.subr.bf16.mxu0 %v569_v0  ;;  %403 = vmatpush3.bf16.msra.mxu1 %v461_v6  ;;  %v463_v8 = vld [vmem:[#allocation7 + $0x30] sm:$0xff]   ;;  %v456_v10 = vld [vmem:[#allocation5 + $0x18] sm:$0xff]   ;;  %v465_v11 = vld [vmem:[#allocation7 + $0x28] sm:$0xff]   ;;  %p543_p2 = scmp.lt.s32.totalorder %s358_s12, %s358_s12 }
  0x29   :  { %404 = vmatprep.subr.bf16.mxu1 %v462_v7  ;;  %v457_v12 = vld [vmem:[#allocation5 + $0x10] sm:$0xff]   ;;  %v458_v13 = vld [vmem:[#allocation5 + $0x8] sm:$0xff]   ;;  %v459_v14 = vld [vmem:[#allocation5] sm:$0xff]  }
  0x2a   :  { %v61_v15 = vld [vmem:[#allocation2] sm:$0xf]  ;;  %v466_v16 = vld [vmem:[#allocation7 + $0x60] sm:$0xff]   ;;  %v470_v20 = vld [vmem:[#allocation7 + $0x50] sm:$0xff]  }
  0x2b   :  { %427 = vmatpush3.bf16.msra.mxu0 %v453_v2  ;;  %v467_v17 = vld [vmem:[#allocation7 + $0x20] sm:$0xff]   ;;  %v468_v18 = vld [vmem:[#allocation7 + $0x58] sm:$0xff]   ;;  %v471_v21 = vld [vmem:[#allocation7 + $0x10] sm:$0xff]  }
  0x2c   :  { %428 = vmatprep.subr.bf16.mxu0 %v569_v0  ;;  %405 = vmatpush3.bf16.msra.mxu1 %v463_v8  ;;  %v469_v19 = vld [vmem:[#allocation7 + $0x18] sm:$0xff]   ;;  %v472_v22 = vld [vmem:[#allocation7 + $0x48] sm:$0xff]   ;;  %v474_v24 = vld [vmem:[#allocation7 + $0x40] sm:$0xff]  }
  0x2d   :  { %406 = vmatprep.subr.bf16.mxu1 %v464_v9  ;;  %v473_v23 = vld [vmem:[#allocation7 + $0x8] sm:$0xff]   ;;  %v475_v25 = vld [vmem:[#allocation7] sm:$0xff]   ;;  %v367_v26 = vld [vmem:[%s622_s2] ss:$0 sm:$0xff]  ;;  %s538_s2 = scalar_lea.vmem %s358_s12, 128 }
  0x2e   :  { %v376_v35 = vld [vmem:[%s624_s4] ss:$0 sm:$0xff]  ;;  %p539_p1 = scmp.ne.s32.totalorder %s358_s12, %s538_s2  ;;  %p544_p3 = scmp.lt.s32.totalorder %s538_s2, %s538_s2 }
  0x2f   :  { %429 = vmatpush3.bf16.msra.mxu0 %v454_v3 }
  0x30   :  { %430 = vmatprep.subr.bf16.mxu0 %v569_v0  ;;  %407 = vmatpush3.bf16.msra.mxu1 %v465_v11  ;;  %p545_p4 = por %p544_p3, %p543_p2 }
  0x31   :  { %408 = vmatprep.subr.bf16.mxu1 %v466_v16 }
  0x32   :  { %p546_p5 = pnand %p545_p4, %p539_p1 }
  0x33   :  { %431 = vmatpush3.bf16.msra.mxu0 %v455_v4 }
  0x34   :  { %432 = vmatprep.subr.bf16.mxu0 %v569_v0  ;;  %409 = vmatpush3.bf16.msra.mxu1 %v467_v17 }
  0x35   :  { %410 = vmatprep.subr.bf16.mxu1 %v468_v18 }
  0x37   :  { %433 = vmatpush3.bf16.msra.mxu0 %v456_v10 }
  0x38   :  { %434 = vmatprep.subr.bf16.mxu0 %v569_v0  ;;  %411 = vmatpush3.bf16.msra.mxu1 %v469_v19 }
  0x39   :  { %412 = vmatprep.subr.bf16.mxu1 %v470_v20 }
  0x3b   :  { %435 = vmatpush3.bf16.msra.mxu0 %v457_v12 }
  0x3c   :  { %436 = vmatprep.subr.bf16.mxu0 %v569_v0  ;;  %413 = vmatpush3.bf16.msra.mxu1 %v471_v21 }
  0x3d   :  { %414 = vmatprep.subr.bf16.mxu1 %v472_v22 }
  0x3f   :  { %437 = vmatpush3.bf16.msra.mxu0 %v458_v13 }
  0x40   :  { %438 = vmatprep.subr.bf16.mxu0 %v569_v0  ;;  %415 = vmatpush3.bf16.msra.mxu1 %v473_v23 }
  0x41   :  { %416 = vmatprep.subr.bf16.mxu1 %v474_v24 }
  0x43   :  { %439 = vmatpush3.bf16.msra.mxu0 %v459_v14 }
  0x44   :  { %417 = vmatpush3.bf16.msra.mxu1 %v475_v25 }
  0x46   :  { %441 = vmatmul.mubr.bf16.vlgmr.msra.gmra.mxu0 %v61_v15 }
 0x106   :  { %v167_v27 = vpop.f32.mrf.mxu0 }
 0x107   :  { %v168_v28 = vadd.f32 %v367_v26, %v167_v27 }
 0x108   :  { %v442_v29 = vpop.f32.mrf.mxu0 }
 0x109   :  { %476 = vtanh.f32 %v168_v28 }
 0x10a   :  { %v170_v30 = vpop.f32.mrf.mxu0 }
 0x10c   :  { %v443_v31 = vpop.f32.mrf.mxu0 }
 0x116   :  { %v477_v32 = vpop.eup %476 }
 0x117   :  { %v174_v33 = vpack.c.bf16 %v477_v32, %v477_v32 }
 0x119   :  { %342 = vmatprep.mubr.bf16.mxu1 %v174_v33 }
 0x11a   :  { %343 = vmatmul.mubr.bf16.vlgmr.msra.gmra.mxu1 %v61_v15 }
 0x1da   :  { %v418_v34 = vpop.f32.mrf.mxu1 }
 0x1dc   :  { %v419_v36 = vpop.f32.mrf.mxu1 }
 0x1dd   :  { %v420_v37 = vadd.f32 %v419_v36, %v418_v34 }
 0x1de   :  { %v421_v38 = vpop.f32.mrf.mxu1 }
 0x1df   :  { %v345_v39 = vadd.f32 %v420_v37, %v376_v35 }
 0x1e0   :  { %v422_v40 = vpop.f32.mrf.mxu1 }
 0x1e1   :  { %350 = vst [vmem:[#allocation8] sm:$0xff] %v345_v39 }
 0x1e2   :  { %549 = shalt.err (!%p546_p5)
}
 0x1e3   :  { %360 = dma.vmem_to_hbm [thread:$0]  %s358_s12, 128, %s625_s5, [#allocation4]  }
 0x1e4   :  { %562 = dma.done.wait [#allocation4], 128  }
 0x1e5   :  { %563 = vsyncadd [#allocation4], 4294967168 }
 0x1e6   :  { %364 = vsyncpa [#allocation3], 1 }
 0x1e7   :  { %365 = vsyncpa [#allocation6], 1 }
 0x1e8   :  { %366 = vsyncpa [#allocation4], 1 }

</bundles_post_ra>
